<compile_context>
chip_gen: v7x
topology: tpu7x:2x2x1
jax: 0.10.0
libtpu: 0.0.40
codegen_flags: <defaults>
</compile_context>

<pallas_src>
import functools

import jax
import jax.numpy as jnp
from jax.experimental import pallas as pl
from jax.experimental.pallas import tpu as pltpu


_LANE = 128
_VMEM_LIMIT = 32 * 1024 * 1024


# ----------------------------- small helpers -------------------------------


def _round_up(x, m):
    return (x + m - 1) // m * m


def _pad_to(a, shape):
    widths = [(0, t - s) for s, t in zip(a.shape, shape)]
    if all(w == (0, 0) for w in widths):
        return a
    return jnp.pad(a, widths)


def _padded_p_and_tile(p):
    """Pad the spatial axis and pick a P-tile (<=256 rows, bf16-friendly)."""
    pp = _round_up(p, 16)
    if pp <= 256:
        return pp, pp
    return _round_up(p, 256), 256


# ----------------------------- Pallas kernels ------------------------------


def _conv_bn_kernel(x_ref, w_ref, s_ref, b_ref, o_ref, *, relu):
    # (TP, K) @ (K, Cout) on the MXU (bf16 in, f32 accumulate),
    # fused BN affine (+ optional ReLU) on the VPU.
    acc = jnp.dot(x_ref[0], w_ref[...], preferred_element_type=jnp.float32)
    y = acc * s_ref[...] + b_ref[...]
    if relu:
        y = jnp.maximum(y, 0.0)
    o_ref[0] = y.astype(o_ref.dtype)


def _conv_bn_add_relu_kernel(x_ref, w_ref, s_ref, b_ref, r_ref, o_ref):
    # conv2 + bn2 + residual add + final ReLU, fused (identity path).
    acc = jnp.dot(x_ref[0], w_ref[...], preferred_element_type=jnp.float32)
    y = acc * s_ref[...] + b_ref[...] + r_ref[0].astype(jnp.float32)
    o_ref[0] = jnp.maximum(y, 0.0).astype(o_ref.dtype)


def _conv_bn_dual_add_relu_kernel(x_ref, w_ref, s_ref, b_ref,
                                  xd_ref, wd_ref, sd_ref, bd_ref, o_ref):
    # conv2 + bn2, plus the fused 1x1 downsample conv + bn (second MXU dot),
    # residual add + final ReLU — all in one pass.
    acc = jnp.dot(x_ref[0], w_ref[...], preferred_element_type=jnp.float32)
    y = acc * s_ref[...] + b_ref[...]
    accd = jnp.dot(xd_ref[0], wd_ref[...], preferred_element_type=jnp.float32)
    y = y + accd * sd_ref[...] + bd_ref[...]
    o_ref[0] = jnp.maximum(y, 0.0).astype(o_ref.dtype)


def _compiler_params():
    return pltpu.CompilerParams(
        dimension_semantics=("parallel", "parallel"),
        vmem_limit_bytes=_VMEM_LIMIT)


def conv_bn(patches, w_mat, scale, bias, *, relu, tile_p):
    N, Ppad, Kpad = patches.shape
    Cpad = w_mat.shape[1]
    kern = functools.partial(_conv_bn_kernel, relu=relu)
    return pl.pallas_call(
        kern,
        out_shape=jax.ShapeDtypeStruct((N, Ppad, Cpad), jnp.float32),
        grid=(N, Ppad // tile_p),
        in_specs=[
            pl.BlockSpec((1, tile_p, Kpad), lambda n, p: (n, p, 0)),
            pl.BlockSpec((Kpad, Cpad), lambda n, p: (0, 0)),
            pl.BlockSpec((1, Cpad), lambda n, p: (0, 0)),
            pl.BlockSpec((1, Cpad), lambda n, p: (0, 0)),
        ],
        out_specs=pl.BlockSpec((1, tile_p, Cpad), lambda n, p: (n, p, 0)),
        compiler_params=_compiler_params(),
    )(patches, w_mat, scale, bias)


def conv_bn_add_relu(patches, w_mat, scale, bias, residual, *, tile_p):
    N, Ppad, Kpad = patches.shape
    Cpad = w_mat.shape[1]
    return pl.pallas_call(
        _conv_bn_add_relu_kernel,
        out_shape=jax.ShapeDtypeStruct((N, Ppad, Cpad), jnp.float32),
        grid=(N, Ppad // tile_p),
        in_specs=[
            pl.BlockSpec((1, tile_p, Kpad), lambda n, p: (n, p, 0)),
            pl.BlockSpec((Kpad, Cpad), lambda n, p: (0, 0)),
            pl.BlockSpec((1, Cpad), lambda n, p: (0, 0)),
            pl.BlockSpec((1, Cpad), lambda n, p: (0, 0)),
            pl.BlockSpec((1, tile_p, Cpad), lambda n, p: (n, p, 0)),
        ],
        out_specs=pl.BlockSpec((1, tile_p, Cpad), lambda n, p: (n, p, 0)),
        compiler_params=_compiler_params(),
    )(patches, w_mat, scale, bias, residual)


def conv_bn_dual_add_relu(patches, w_mat, scale, bias,
                          d_patches, d_w_mat, d_scale, d_bias, *, tile_p):
    N, Ppad, Kpad = patches.shape
    Cpad = w_mat.shape[1]
    Kdpad = d_patches.shape[-1]
    return pl.pallas_call(
        _conv_bn_dual_add_relu_kernel,
        out_shape=jax.ShapeDtypeStruct((N, Ppad, Cpad), jnp.float32),
        grid=(N, Ppad // tile_p),
        in_specs=[
            pl.BlockSpec((1, tile_p, Kpad), lambda n, p: (n, p, 0)),
            pl.BlockSpec((Kpad, Cpad), lambda n, p: (0, 0)),
            pl.BlockSpec((1, Cpad), lambda n, p: (0, 0)),
            pl.BlockSpec((1, Cpad), lambda n, p: (0, 0)),
            pl.BlockSpec((1, tile_p, Kdpad), lambda n, p: (n, p, 0)),
            pl.BlockSpec((Kdpad, Cpad), lambda n, p: (0, 0)),
            pl.BlockSpec((1, Cpad), lambda n, p: (0, 0)),
            pl.BlockSpec((1, Cpad), lambda n, p: (0, 0)),
        ],
        out_specs=pl.BlockSpec((1, tile_p, Cpad), lambda n, p: (n, p, 0)),
        compiler_params=_compiler_params(),
    )(patches, w_mat, scale, bias, d_patches, d_w_mat, d_scale, d_bias)


# ------------------------------- JAX glue ----------------------------------


def im2col(x_nhwc, ksize, stride):
    """Extract (N, Ho*Wo, ksize*ksize*C) patches; padding = ksize // 2."""
    N, H, W, C = x_nhwc.shape
    pad = ksize // 2
    xp = jnp.pad(x_nhwc, ((0, 0), (pad, pad), (pad, pad), (0, 0)))
    Ho = (H + 2 * pad - ksize) // stride + 1
    Wo = (W + 2 * pad - ksize) // stride + 1
    cols = []
    for dh in range(ksize):
        for dw in range(ksize):
            cols.append(
                xp[:, dh:dh + stride * (Ho - 1) + 1:stride,
                      dw:dw + stride * (Wo - 1) + 1:stride, :]
            )
    patches = jnp.concatenate(cols, axis=-1)  # (N, Ho, Wo, k*k*C)
    return patches.reshape(N, Ho * Wo, ksize * ksize * C), Ho, Wo


def conv_weight_to_matrix(w_oikk):
    """PyTorch (Cout, Cin, kh, kw) -> (kh*kw*Cin, Cout) matching im2col order."""
    Cout, Cin, kh, kw = w_oikk.shape
    return jnp.transpose(w_oikk, (2, 3, 1, 0)).reshape(kh * kw * Cin, Cout)


def fold_bn(gamma, beta, mean, var, eps=1e-5):
    scale = gamma / jnp.sqrt(var + eps)
    bias = beta - mean * scale
    return scale.reshape(1, -1), bias.reshape(1, -1)


def init_basic_block_params(key, inplanes, planes, stride):
    ks = jax.random.split(key, 12)

    def bn_params(k, c):
        k1, k2, k3, k4 = jax.random.split(k, 4)
        gamma = jax.random.uniform(k1, (c,), jnp.float32, 0.5, 1.5)
        beta = jax.random.normal(k2, (c,), jnp.float32) * 0.1
        mean = jax.random.normal(k3, (c,), jnp.float32) * 0.1
        var = jax.random.uniform(k4, (c,), jnp.float32, 0.5, 1.5)
        return gamma, beta, mean, var

    params = {
        "conv1_w": jax.random.normal(ks[0], (planes, inplanes, 3, 3), jnp.float32) * 0.1,
        "bn1": bn_params(ks[1], planes),
        "conv2_w": jax.random.normal(ks[2], (planes, planes, 3, 3), jnp.float32) * 0.1,
        "bn2": bn_params(ks[3], planes),
    }
    if stride != 1 or inplanes != planes:
        params["convd_w"] = jax.random.normal(
            ks[4], (planes, inplanes, 1, 1), jnp.float32) * 0.1
        params["bnd"] = bn_params(ks[5], planes)
    return params


def basic_block_forward(x_nchw, params, inplanes, planes, stride):
    # NCHW -> NHWC
    x = jnp.transpose(x_nchw, (0, 2, 3, 1)).astype(jnp.float32)
    N, H, W, _ = x.shape
    Cpad = _round_up(planes, _LANE)

    # ---- conv1 (3x3, stride) + bn1 + relu ----------------------------------
    p1, Ho, Wo = im2col(x, 3, stride)                     # (N, P, 9*inplanes)
    P = Ho * Wo
    Ppad, TP = _padded_p_and_tile(P)
    K1pad = _round_up(p1.shape[-1], _LANE)
    p1p = _pad_to(p1, (N, Ppad, K1pad)).astype(jnp.bfloat16)
    w1 = _pad_to(conv_weight_to_matrix(params["conv1_w"]),
                 (K1pad, Cpad)).astype(jnp.bfloat16)
    s1, b1 = fold_bn(*params["bn1"])
    s1 = _pad_to(s1, (1, Cpad))
    b1 = _pad_to(b1, (1, Cpad))
    out1 = conv_bn(p1p, w1, s1, b1, relu=True, tile_p=TP)  # (N, Ppad, Cpad) f32

    # ---- conv2 (3x3, stride 1) patches --------------------------------------
    out1_nhwc = out1[:, :P, :planes].reshape(N, Ho, Wo, planes)
    # TODO(synk): fuse the 3x3 tap gathering (im2col) into the kernels via
    # in-kernel shifted/rolled reads so out1 / x never round-trip HBM as 9x
    # patches; currently im2col is materialized in JAX.
    p2, _, _ = im2col(out1_nhwc, 3, 1)                    # (N, P, 9*planes)
    K2pad = _round_up(p2.shape[-1], _LANE)
    p2p = _pad_to(p2, (N, Ppad, K2pad)).astype(jnp.bfloat16)
    w2 = _pad_to(conv_weight_to_matrix(params["conv2_w"]),
                 (K2pad, Cpad)).astype(jnp.bfloat16)
    s2, b2 = fold_bn(*params["bn2"])
    s2 = _pad_to(s2, (1, Cpad))
    b2 = _pad_to(b2, (1, Cpad))

    if "convd_w" in params:
        # Downsample identity: 1x1 strided conv needs no im2col — just a
        # strided spatial slice — and is fused into the conv2+add+relu kernel
        # as a second MXU dot (uses MXU slack, removes an extra pallas_call
        # and an identity-tensor HBM round-trip).
        xd = x[:, ::stride, ::stride, :].reshape(N, P, inplanes)
        Kdpad = _round_up(inplanes, _LANE)
        xdp = _pad_to(xd, (N, Ppad, Kdpad)).astype(jnp.bfloat16)
        wd = _pad_to(conv_weight_to_matrix(params["convd_w"]),
                     (Kdpad, Cpad)).astype(jnp.bfloat16)
        sd, bd = fold_bn(*params["bnd"])
        sd = _pad_to(sd, (1, Cpad))
        bd = _pad_to(bd, (1, Cpad))
        out = conv_bn_dual_add_relu(p2p, w2, s2, b2, xdp, wd, sd, bd, tile_p=TP)
    else:
        identity = x.reshape(N, H * W, inplanes)          # inplanes == planes
        rid = _pad_to(identity, (N, Ppad, Cpad)).astype(jnp.bfloat16)
        out = conv_bn_add_relu(p2p, w2, s2, b2, rid, tile_p=TP)

    # strip padding, back to NCHW
    out = out[:, :P, :planes].reshape(N, Ho, Wo, planes)
    return jnp.transpose(out, (0, 3, 1, 2))


if __name__ == "__main__":
    # Small, downsampling configuration: inplanes=4 -> planes=8, stride=2.
    N, inplanes, planes, stride, H, W = 2, 4, 8, 2, 16, 16

    key = jax.random.PRNGKey(0)
    kx, kp = jax.random.split(key)
    x = jax.random.normal(kx, (N, inplanes, H, W), jnp.float32)
    params = init_basic_block_params(kp, inplanes, planes, stride)

    out = basic_block_forward(x, params, inplanes, planes, stride)
    out = jax.block_until_ready(out)

    assert out.shape == (N, planes, H // stride, W // stride), out.shape
    assert bool(jnp.all(out >= 0.0))  # final ReLU
    print("KERNEL_OK")
</pallas_src>

<mosaic_0001>
module attributes {stable_mosaic.version = 11 : i64} {
  func.func @_conv_bn_kernel(%arg0: i32, %arg1: i32, %arg2: memref<1x64x128xbf16, #tpu.memory_space<vmem>>, %arg3: memref<128x128xbf16, #tpu.memory_space<vmem>>, %arg4: memref<1x128xf32, #tpu.memory_space<vmem>>, %arg5: memref<1x128xf32, #tpu.memory_space<vmem>>, %arg6: memref<1x64x128xf32, #tpu.memory_space<vmem>>) attributes {dimension_semantics = [#tpu.dimension_semantics<parallel>, #tpu.dimension_semantics<parallel>], iteration_bounds = array<i64: 2, 1>, scalar_prefetch = 0 : i64, scratch_operands = 0 : i64, tpu.core_type = #tpu.core_type<tc>, window_params = [{transform_indices = @transform_0, window_bounds = array<i64: 1, 64, 128>}, {pipeline_mode = #tpu.pipeline_mode<synchronous>, transform_indices = @transform_1, window_bounds = array<i64: 128, 128>}, {pipeline_mode = #tpu.pipeline_mode<synchronous>, transform_indices = @transform_2, window_bounds = array<i64: 1, 128>}, {pipeline_mode = #tpu.pipeline_mode<synchronous>, transform_indices = @transform_3, window_bounds = array<i64: 1, 128>}, {transform_indices = @transform_4, window_bounds = array<i64: 1, 64, 128>}]} {
    %c0 = arith.constant 0 : index
    %c0_0 = arith.constant 0 : index
    %c0_1 = arith.constant 0 : index
    %0 = vector.load %arg2[%c0, %c0_0, %c0_1] : memref<1x64x128xbf16, #tpu.memory_space<vmem>>, vector<1x64x128xbf16>
    %1 = vector.shape_cast %0 : vector<1x64x128xbf16> to vector<64x128xbf16>
    %c0_2 = arith.constant 0 : index
    %c0_3 = arith.constant 0 : index
    %2 = vector.load %arg3[%c0_2, %c0_3] : memref<128x128xbf16, #tpu.memory_space<vmem>>, vector<128x128xbf16>
    %cst = arith.constant dense<0.000000e+00> : vector<64x128xf32>
    %3 = tpu.matmul %1, %2, %cst {dimension_numbers = #tpu.dot_dimension_numbers<[1], [0], [0], [1], [0, 0, 1, 1], [], []>} : vector<64x128xbf16>, vector<128x128xbf16>, vector<64x128xf32> -> vector<64x128xf32>
    %c0_4 = arith.constant 0 : index
    %c0_5 = arith.constant 0 : index
    %4 = vector.load %arg4[%c0_4, %c0_5] : memref<1x128xf32, #tpu.memory_space<vmem>>, vector<1x128xf32>
    %5 = vector.broadcast %4 : vector<1x128xf32> to vector<64x128xf32>
    %6 = arith.mulf %3, %5 : vector<64x128xf32>
    %c0_6 = arith.constant 0 : index
    %c0_7 = arith.constant 0 : index
    %7 = vector.load %arg5[%c0_6, %c0_7] : memref<1x128xf32, #tpu.memory_space<vmem>>, vector<1x128xf32>
    %8 = vector.broadcast %7 : vector<1x128xf32> to vector<64x128xf32>
    %9 = arith.addf %6, %8 : vector<64x128xf32>
    %cst_8 = arith.constant 0.000000e+00 : f32
    %10 = vector.broadcast %cst_8 : f32 to vector<64x128xf32>
    %11 = arith.maximumf %9, %10 : vector<64x128xf32>
    %c0_9 = arith.constant 0 : index
    %c0_10 = arith.constant 0 : index
    %c0_11 = arith.constant 0 : index
    %12 = vector.load %arg6[%c0_9, %c0_10, %c0_11] : memref<1x64x128xf32, #tpu.memory_space<vmem>>, vector<1x64x128xf32>
    %13 = vector.shape_cast %12 : vector<1x64x128xf32> to vector<64x128xf32>
    %14 = vector.shape_cast %11 : vector<64x128xf32> to vector<1x64x128xf32>
    tpu.vector_store %arg6[%c0_9, %c0_10, %c0_11], %14 {strides = array<i32>} : memref<1x64x128xf32, #tpu.memory_space<vmem>>, vector<1x64x128xf32>,
    return
  }
  func.func @transform_0(%arg0: i32, %arg1: i32) -> (i32, i32, i32) {
    %c0_i32 = arith.constant 0 : i32
    %c0_i32_0 = arith.constant 0 : i32
    return %arg0, %arg1, %c0_i32 : i32, i32, i32
  }
  func.func @transform_1(%arg0: i32, %arg1: i32) -> (i32, i32) {
    %c0_i32 = arith.constant 0 : i32
    %c0_i32_0 = arith.constant 0 : i32
    %c0_i32_1 = arith.constant 0 : i32
    return %c0_i32, %c0_i32_0 : i32, i32
  }
  func.func @transform_2(%arg0: i32, %arg1: i32) -> (i32, i32) {
    %c0_i32 = arith.constant 0 : i32
    %c0_i32_0 = arith.constant 0 : i32
    %c0_i32_1 = arith.constant 0 : i32
    return %c0_i32, %c0_i32_0 : i32, i32
  }
  func.func @transform_3(%arg0: i32, %arg1: i32) -> (i32, i32) {
    %c0_i32 = arith.constant 0 : i32
    %c0_i32_0 = arith.constant 0 : i32
    %c0_i32_1 = arith.constant 0 : i32
    return %c0_i32, %c0_i32_0 : i32, i32
  }
  func.func @transform_4(%arg0: i32, %arg1: i32) -> (i32, i32, i32) {
    %c0_i32 = arith.constant 0 : i32
    %c0_i32_0 = arith.constant 0 : i32
    return %arg0, %arg1, %c0_i32 : i32, i32, i32
  }
}

</mosaic_0001>

<bundles_post_ra>
// kernel: tpu_custom_call.1
= control target key start
LH: loop header
LB: loop body
LE: loop exit
PB: predicated region body
PF: predicated region fallthrough
CT: control target
= control target key end

     0   :  { %9 = vsyncpa [#allocation3], 0  ;;  %s1173_s0 = inlined_call_operand.hbm [shape: bf16[2,64,128], index: 0, kind: input, shape index: {}]   ;;  %s1174_s1 = inlined_call_operand.hbm [shape: bf16[128,128], index: 1, kind: input, shape index: {}]   ;;  %s1175_s2 = inlined_call_operand.vmem [shape: f32[1,128], index: 2, kind: input, shape index: {}]   ;;  %s1176_s3 = inlined_call_operand.vmem [shape: f32[1,128], index: 3, kind: input, shape index: {}]   ;;  %s1177_s4 = inlined_call_operand.hbm [shape: f32[2,64,128], index: 4, kind: output, shape index: {}]  }
   0x1   :  { %11 = vsyncpa [#allocation3 + $0x1], 0 }
   0x2   :  { %12 = vsyncpa [#allocation6], 0 }
   0x3   :  { %13 = vsyncpa [#allocation4], 0 }
   0x4   :  { %15 = vsyncpa [#allocation4 + $0x1], 0  ;;  %s924_s15 = smov 0   ;;  %s926_s16 = smov 0  }
   0x5   :  { %s928_s17 = smov 0   ;;  %s930_s18 = smov 0  }
   0x6   :  { %s932_s19 = smov 0   ;;  %s934_s20 = smov 0  }
   0x7 LB: > { %s572_s21 = sadd.s32 4294967295, %s890_s20   ;;  %s573_s22 = sadd.s32 4294967294, %s890_s20   ;;  %s890_s20 = sphi %s934_s20, %s21_s20   ;;  %s886_s19 = sphi %s932_s19, %s1201_s19   ;;  %s882_s18 = sphi %s930_s18, %s1200_s18   ;;  %s878_s17 = sphi %s928_s17, %s1199_s17   ;;  %s874_s16 = sphi %s926_s16, %s1198_s16   ;;  %s870_s15 = sphi %s924_s15, %s1197_s15  }
   0x8   : > { %p55_p0 = scmp.ne.s32.totalorder %s874_s16, %s870_s15  ;;  %p958_p1 = scmp.eq.s32.totalorder %s572_s21, 0 }
   0x9   : > { %p962_p2 = scmp.eq.s32.totalorder %s572_s21, 1  ;;  %p150_p3 = scmp.eq.s32.totalorder %s573_s22, 1 }
   0xa   : > { %s1182_s23 = scalar_select %p958_p1, 1, 0 }
   0xb   : > { %s1183_s24 = scalar_select %p962_p2, 1, 0 }
   0xc   : > { %p968_p4 = por %p958_p1, %p55_p0  ;;  %p574_p5 = scmp.ge.s32.totalorder %s890_s20, 1 }
   0xd   : > { %p973_p6 = por %p150_p3, %p55_p0  ;;  %p157_p7 = scmp.lt.s32.totalorder %s890_s20, 3 }
   0xe   : > { %s1184_s25 = scalar_select %p968_p4, 1, 0 }
   0xf   : > { %s1185_s26 = scalar_select %p973_p6, 1, 0 }
  0x10   : > { %p978_p8 = pnand %p574_p5, %p157_p7  ;;  %s892_s28 = smov [#allocation5]  }
  0x11   : > { %s169_s29 = sshll.u32 %s892_s28, 4  ;;  %s33_s5 = sadd.s32 1, %s886_s19  ;;  %s170_s29 = int_to_ptr.vmem [resolvable:$true] %s169_s29 }
  0x12   : > { %s1186_s27 = scalar_select %p978_p8, 1, 0 }
  0x13   : > { %p665_p9 = pneg %p978_p8  ;;  %s746_s8 = scalar_lea.hbm %s1174_s1, 1024 }
  0x14   : > { %p747_p12 = scmp.ne.s32.totalorder %s1174_s1, %s746_s8  ;;  %p753_p5 = scmp.lt.u32.totalorder %s746_s8, %s1174_s1 }
  0x15   : > { %p987_p11 = pnand %p665_p9, %p958_p1 }
  0x17   : > { %p748_p13 = pneg %p987_p11 }
  0x19   : > { %p749_p0 = pnand %p748_p13, %p747_p12 }
  0x1b   : > { %p750_p3 = pneg %p749_p0 }
  0x1d   : > { %p755_p7 = pnand %p753_p5, %p750_p3 }
  0x1f   : > { %758 = shalt.err (!%p755_p7)
}
  0x20   : > { %s759_s13 = scalar_lea.vmem %s170_s29, 1024  ;;  %p767_p1 = scmp.lt.s32.totalorder %s170_s29, %s170_s29 }
  0x21   : > { %p760_p9 = scmp.ne.s32.totalorder %s170_s29, %s759_s13  ;;  %p768_p4 = scmp.lt.s32.totalorder %s759_s13, %s759_s13 }
  0x23   : > { %p762_p10 = pnand %p760_p9, %p748_p13  ;;  %p769_p8 = por %p768_p4, %p767_p1 }
  0x25   : > { %p763_p6 = pneg %p762_p10 }
  0x27   : > { %p770_p2 = pnand %p769_p8, %p763_p6 }
  0x29   : > { %773 = shalt.err (!%p770_p2)
}
  0x2a   : > { %s893_s14 = smov 64   ;;  %s894_s21 = smov 4  }
  0x2b   : > { %668 = dma.hbm_to_vmem [thread:$0]  (!%p987_p11), %s1174_s1, 1024, %s170_s29, [#allocation6], %s893_s14, %s893_s14, %s894_s21  }
  0x2c   : > { %p35_p1 = scmp.ge.s32.totalorder %s33_s5, 2  ;;  %s42_s6 = sadd.s32 1, %s878_s17 }
  0x2d   : > { %p49_p2 = scmp.ne.s32.totalorder %s878_s17, %s874_s16  ;;  %p50_p4 = scmp.eq.s32.totalorder %s890_s20, 0 }
  0x2e   : > { %s1203_s5 = smov (%p35_p1, %s33_s5), 0  ;;  %p1189_p8 = scmp.ne.s32.totalorder %s1183_s24, 0 }
  0x2f   : > { %p1017_p6 = por %p50_p4, %p49_p2  ;;  %s37_s8 = ssub.s32 %s886_s19, %s1203_s5 }
  0x30   : > { %p1023_p10 = por %p1189_p8, %p49_p2  ;;  %p678_p12 = scmp.lt.s32.totalorder %s890_s20, 2 }
  0x31   : > { %p40_p11 = scmp.eq.s32.totalorder %s37_s8, 0  ;;  %s189_s29 = sand.u32 1, %s878_s17  }
  0x32   : > { %s577_s9 = sshll.u32 %s189_s29, 5  ;;  %s603_s11 = sshll.u32 %s886_s19, 9 }
  0x33   : > { %s1032_s10 = scalar_select %p40_p11, %s878_s17, %s42_s6  }
  0x34   : > { %s1038_s22 = scalar_lea.hbm %s1173_s0, %s603_s11  ;;  %s193_s24 = scalar_lea.vmem [#allocation2], %s577_s9 }
  0x35   : > { %s202_s28 = sshll.u32 %s193_s24, 4  ;;  %p1044_p13 = pnand %p678_p12, %p1017_p6  ;;  %s1040_s28 = int_to_ptr.vmem [resolvable:$true] %s202_s28 }
  0x36   : > { %s1048_s6 = scalar_lea.sflag [#allocation3], %s189_s29  ;;  %s774_s12 = scalar_lea.hbm %s1038_s22, 512 }
  0x37   : > { %p775_p0 = scmp.ne.s32.totalorder %s1038_s22, %s774_s12  ;;  %p776_p3 = pneg %p1044_p13 }
  0x38   : > { %s779_s7 = scalar_lea.hbm %s1173_s0, 1024  ;;  %p780_p9 = scmp.lt.u32.totalorder %s1038_s22, %s1173_s0 }
  0x39   : > { %p777_p5 = pnand %p776_p3, %p775_p0  ;;  %p781_p1 = scmp.lt.u32.totalorder %s779_s7, %s774_s12 }
  0x3a   : > { %p783_p4 = scmp.lt.u32.totalorder %s774_s12, %s1038_s22 }
  0x3b   : > { %p778_p7 = pneg %p777_p5  ;;  %p782_p2 = por %p781_p1, %p780_p9 }
  0x3d   : > { %p784_p6 = por %p783_p4, %p782_p2 }
  0x3f   : > { %p785_p8 = pnand %p784_p6, %p778_p7 }
  0x41   : > { %788 = shalt.err (!%p785_p8)
}
  0x42   : > { %s789_s29 = scalar_lea.vmem %s1040_s28, 512  ;;  %s895_s9 = smov [#allocation2]  }
  0x43   : > { %p790_p12 = scmp.ne.s32.totalorder %s1040_s28, %s789_s29  ;;  %s794_s11 = sshll.u32 %s895_s9, 4  ;;  %s795_s11 = int_to_ptr.vmem [resolvable:$false] %s794_s11 }
  0x44   : > { %s796_s13 = scalar_lea.vmem %s795_s11, 1024  ;;  %p797_p5 = scmp.lt.s32.totalorder %s1040_s28, %s795_s11 }
  0x45   : > { %p792_p11 = pnand %p790_p12, %p776_p3  ;;  %p798_p9 = scmp.lt.s32.totalorder %s796_s13, %s789_s29 }
  0x47   : > { %p793_p0 = pneg %p792_p11  ;;  %p799_p1 = por %p798_p9, %p797_p5 }
  0x49   : > { %p800_p2 = pnand %p799_p1, %p793_p0 }
  0x4b   : > { %803 = shalt.err (!%p800_p2)
}
  0x4c   : > { %672 = dma.hbm_to_vmem [thread:$0]  (!%p1044_p13), %s1038_s22, 512, %s1040_s28, %s1048_s6, %s893_s14, %s893_s14, %s894_s21  }
  0x4d   : > { %p1192_p3 = scmp.ne.s32.totalorder %s1186_s27, 0 }
  0x4e   : > { %s1082_s12 = sand.u32 (!%p1192_p3), 1, %s874_s16   ;;  %p1193_p7 = scmp.ne.s32.totalorder (!%p1192_p3), %s1184_s25, 0 }
  0x4f   : > { %214 = sbr.rel (%p1192_p3) target bundleno = 359 (0x167), region = 36  ;;  %s581_s7 = sshll.u32 (!%p1192_p3), %s1082_s12, 5 }
  0x50   : > { %s217_s24 = scalar_lea.sflag (!%p1192_p3), [#allocation3], %s1082_s12  ;;  %s1086_s29 = scalar_lea.vmem (!%p1192_p3), [#allocation2], %s581_s7 }
  0x56   : > { %857 = dma.done.wait (%p1193_p7), %s217_s24, 512  }
  0x57   : > { %859 = vsyncadd (%p1193_p7), %s217_s24, 4294966784  ;;  %p1194_p13 = scmp.ne.s32.totalorder %s1182_s23, 0 }
  0x59   : > { %861 = dma.done.wait (%p1194_p13), [#allocation6], 1024  }
  0x5a   : > { %863 = vsyncadd (%p1194_p13), [#allocation6], 4294966272  ;;  %v734_v0 = vld [vmem:[#allocation5] sm:$0xff]   ;;  %v735_v1 = vld [vmem:[#allocation5 + $0x8] sm:$0xff]   ;;  %s583_s27 = sshll.u32 %s1082_s12, 6  ;;  %s604_s8 = sshll.u32 %s882_s18, 10 }
  0x5b   : > { %617 = vmatprep.subr.bf16.mxu0 %v734_v0  ;;  %641 = vmatprep.subr.bf16.mxu1 %v734_v0  ;;  %v736_v2 = vld [vmem:[#allocation5 + $0x10] sm:$0xff]   ;;  %v737_v3 = vld [vmem:[#allocation5 + $0x18] sm:$0xff]   ;;  %v742_v4 = vld [vmem:[%s1086_s29] sm:$0xff]   ;;  %s1107_s22 = scalar_lea.vmem [#allocation7], %s583_s27  ;;  %s1118_s9 = scalar_lea.hbm %s1177_s4, %s604_s8 }
  0x5c   : > { %618 = vmatpush3.bf16.msra.mxu0 %v734_v0  ;;  %649 = vmatpush3.bf16.msra.mxu1 %v734_v0  ;;  %v743_v5 = vld [vmem:[%s1086_s29 + $0x10] sm:$0xff]   ;;  %v738_v6 = vld [vmem:[#allocation5 + $0x20] sm:$0xff]   ;;  %v739_v7 = vld [vmem:[#allocation5 + $0x28] sm:$0xff]   ;;  %s475_s28 = sshll.u32 %s1107_s22, 4  ;;  %s460_s11 = scalar_lea.sflag [#allocation4], %s1082_s12  ;;  %s1111_s28 = int_to_ptr.vmem [resolvable:$true] %s475_s28 }
  0x5d   : > { %619 = vmatprep.subr.bf16.mxu0 %v735_v1  ;;  %642 = vmatprep.subr.bf16.mxu1 %v735_v1  ;;  %v740_v8 = vld [vmem:[#allocation5 + $0x30] sm:$0xff]   ;;  %v741_v9 = vld [vmem:[#allocation5 + $0x38] sm:$0xff]   ;;  %v744_v10 = vld [vmem:[%s1086_s29 + $0x8] sm:$0xff]   ;;  %s804_s13 = scalar_lea.vmem %s1111_s28, 1024  ;;  %s896_s7 = smov [#allocation7]  }
  0x5e   : > { %633 = vmatprep.mubr.bf16.mxu0 %v742_v4  ;;  %637 = vmatprep.mubr.bf16.mxu1 %v743_v5  ;;  %v745_v11 = vld [vmem:[%s1086_s29 + $0x18] sm:$0xff]   ;;  %v596_v12 = vld [vmem:[%s1175_s2] ss:$0 sm:$0xff]  ;;  %p805_p4 = scmp.ne.s32.totalorder %s1111_s28, %s804_s13  ;;  %s808_s24 = sshll.u32 %s896_s7, 4  ;;  %s809_s24 = int_to_ptr.vmem [resolvable:$false] %s808_s24 }
  0x5f   : > { %v597_v14 = vld [vmem:[%s1176_s3] ss:$0 sm:$0xff]  ;;  %s810_s29 = scalar_lea.vmem %s809_s24, 2048  ;;  %p811_p12 = scmp.lt.s32.totalorder %s1111_s28, %s809_s24 }
  0x60   : > { %620 = vmatpush3.bf16.msra.mxu0 %v735_v1  ;;  %650 = vmatpush3.bf16.msra.mxu1 %v735_v1  ;;  %p806_p6 = pnand %p805_p4, %p1023_p10  ;;  %p812_p11 = scmp.lt.s32.totalorder %s810_s29, %s804_s13 }
  0x61   : > { %621 = vmatprep.subr.bf16.mxu0 %v736_v2  ;;  %643 = vmatprep.subr.bf16.mxu1 %v736_v2 }
  0x62   : > { %p807_p8 = pneg %p806_p6  ;;  %p813_p0 = por %p812_p11, %p811_p12 }
  0x64   : > { %622 = vmatpush3.bf16.msra.mxu0 %v736_v2  ;;  %651 = vmatpush3.bf16.msra.mxu1 %v736_v2  ;;  %p814_p5 = pnand %p813_p0, %p807_p8 }
  0x65   : > { %623 = vmatprep.subr.bf16.mxu0 %v737_v3  ;;  %644 = vmatprep.subr.bf16.mxu1 %v737_v3 }
  0x68   : > { %624 = vmatpush3.bf16.msra.mxu0 %v737_v3  ;;  %652 = vmatpush3.bf16.msra.mxu1 %v737_v3 }
  0x69   : > { %625 = vmatprep.subr.bf16.mxu0 %v738_v6  ;;  %645 = vmatprep.subr.bf16.mxu1 %v738_v6 }
  0x6c   : > { %626 = vmatpush3.bf16.msra.mxu0 %v738_v6  ;;  %653 = vmatpush3.bf16.msra.mxu1 %v738_v6 }
  0x6d   : > { %627 = vmatprep.subr.bf16.mxu0 %v739_v7  ;;  %646 = vmatprep.subr.bf16.mxu1 %v739_v7 }
  0x70   : > { %628 = vmatpush3.bf16.msra.mxu0 %v739_v7  ;;  %654 = vmatpush3.bf16.msra.mxu1 %v739_v7 }
  0x71   : > { %629 = vmatprep.subr.bf16.mxu0 %v740_v8  ;;  %647 = vmatprep.subr.bf16.mxu1 %v740_v8 }
  0x74   : > { %630 = vmatpush3.bf16.msra.mxu0 %v740_v8  ;;  %655 = vmatpush3.bf16.msra.mxu1 %v740_v8 }
  0x75   : > { %631 = vmatprep.subr.bf16.mxu0 %v741_v9  ;;  %648 = vmatprep.subr.bf16.mxu1 %v741_v9 }
  0x78   : > { %632 = vmatpush3.bf16.msra.mxu0 %v741_v9  ;;  %656 = vmatpush3.bf16.msra.mxu1 %v741_v9 }
  0x7b   : > { %634 = vmatmul.mubr.bf16.vlgmr.msra.gmra.mrb[0].mxu0 %v744_v10  ;;  %638 = vmatmul.mubr.bf16.vlgmr.msra.gmra.mrb[0].mxu1 %v745_v11 }
 0x14e   : > { %v635_v13 = vpop.f32.mrb[0].mxu0  ;;  %v639_v15 = vpop.f32.mrb[0].mxu1 }
 0x14f   : > { %v422_v16 = vmul.f32 %v635_v13, %v596_v12  ;;  %v426_v17 = vmul.f32 %v639_v15, %v596_v12  ;;  %v382_v18 = vpop.f32.mrb[1].mxu0  ;;  %v398_v19 = vpop.f32.mrb[1].mxu1 }
 0x150   : > { %v420_v20 = vmul.f32 %v596_v12, %v382_v18  ;;  %v424_v21 = vmul.f32 %v596_v12, %v398_v19  ;;  %v636_v22 = vpop.f32.mrb[2].mxu0  ;;  %v640_v23 = vpop.f32.mrb[2].mxu1 }
 0x151   : > { %v437_v24 = vadd.f32 %v597_v14, %v422_v16  ;;  %v441_v25 = vadd.f32 %v597_v14, %v426_v17  ;;  %v423_v26 = vmul.f32 %v636_v22, %v596_v12  ;;  %v427_v27 = vmul.f32 %v640_v23, %v596_v12  ;;  %v385_v28 = vpop.f32.mrb[3].mxu0  ;;  %v401_v29 = vpop.f32.mrb[3].mxu1 }
 0x152   : > { %v435_v30 = vadd.f32 %v597_v14, %v420_v20  ;;  %v439_v31 = vadd.f32 %v597_v14, %v424_v21  ;;  %v421_v32 = vmul.f32 %v596_v12, %v385_v28  ;;  %v425_v33 = vmul.f32 %v596_v12, %v401_v29 }
 0x153   : > { %v445_v34 = vmax.f32 %v437_v24, 0.0  ;;  %v449_v35 = vmax.f32 %v441_v25, 0.0  ;;  %v438_v36 = vadd.f32 %v597_v14, %v423_v26  ;;  %v442_v37 = vadd.f32 %v597_v14, %v427_v27 }
 0x154   : > { %v443_v38 = vmax.f32 %v435_v30, 0.0  ;;  %v447_v39 = vmax.f32 %v439_v31, 0.0  ;;  %v436_v40 = vadd.f32 %v597_v14, %v421_v32  ;;  %v440_v41 = vadd.f32 %v597_v14, %v425_v33 }
 0x155   : > { %453 = vst [vmem:[%s1107_s22 + $0x10] sm:$0xff] %v445_v34  ;;  %457 = vst [vmem:[%s1107_s22 + $0x30] sm:$0xff] %v449_v35  ;;  %v446_v42 = vmax.f32 %v438_v36, 0.0  ;;  %v450_v43 = vmax.f32 %v442_v37, 0.0 }
 0x156   : > { %451 = vst [vmem:[%s1107_s22] sm:$0xff] %v443_v38  ;;  %455 = vst [vmem:[%s1107_s22 + $0x20] sm:$0xff] %v447_v39  ;;  %v444_v44 = vmax.f32 %v436_v40, 0.0  ;;  %v448_v45 = vmax.f32 %v440_v41, 0.0 }
 0x157   : > { %454 = vst [vmem:[%s1107_s22 + $0x18] sm:$0xff] %v446_v42  ;;  %458 = vst [vmem:[%s1107_s22 + $0x38] sm:$0xff] %v450_v43 }
 0x158   : > { %452 = vst [vmem:[%s1107_s22 + $0x8] sm:$0xff] %v444_v44  ;;  %456 = vst [vmem:[%s1107_s22 + $0x28] sm:$0xff] %v448_v45 }
 0x159   : > { %817 = shalt.err (!%p814_p5)
}
 0x15a   : > { %s818_s23 = scalar_lea.hbm %s1118_s9, 1024  ;;  %s822_s14 = scalar_lea.hbm %s1177_s4, 2048 }
 0x15b   : > { %p819_p9 = scmp.ne.s32.totalorder %s1118_s9, %s818_s23  ;;  %p823_p3 = scmp.lt.u32.totalorder %s1118_s9, %s1177_s4 }
 0x15c   : > { %p824_p7 = scmp.lt.u32.totalorder %s822_s14, %s818_s23  ;;  %p826_p4 = scmp.lt.u32.totalorder %s818_s23, %s1118_s9 }
 0x15d   : > { %p820_p1 = pnand %p819_p9, %p1023_p10 }
 0x15e   : > { %p825_p13 = por %p824_p7, %p823_p3 }
 0x15f   : > { %p821_p2 = pneg %p820_p1 }
 0x160   : > { %p827_p6 = por %p826_p4, %p825_p13 }
 0x162   : > { %p828_p8 = pnand %p827_p6, %p821_p2 }
 0x164   : > { %831 = shalt.err (!%p828_p8)
}
 0x165   : > { %s897_s8 = smov 128   ;;  %s898_s18 = smov 8  }
 0x166   : > { %663 = dma.vmem_to_hbm [thread:$0]  (%p1023_p10), %s1111_s28, 1024, %s1118_s9, %s460_s11, %s897_s8, %s897_s8, %s898_s18  }
 0x167 PF: > { %s490_s6 = sand.u32 1, %s870_s15   ;;  %p1195_p12 = scmp.ne.s32.totalorder %s1185_s26, 0 }
 0x168   : > { %p1196_p11 = scmp.ge.s32.totalorder %s890_s20, 2  ;;  %s491_s13 = scalar_lea.sflag [#allocation4], %s490_s6 }
 0x16a   : > { %p674_p0 = pnand %p1196_p11, %p1195_p12 }
 0x16c   : > { %865 = dma.done.wait (!%p674_p0), %s491_s13, 1024  }
 0x16d   : > { %867 = vsyncadd (!%p674_p0), %s491_s13, 4294966272  ;;  %s21_s20 = sadd.s32 1, %s890_s20   ;;  %s1197_s15 = smov %s874_s16 }
 0x16e   : > { %p18_p5 = scmp.ge.s32.totalorder %s21_s20, 4   ;;  %s1198_s16 = smov %s878_s17 }
 0x16f   : > { %s1199_s17 = smov %s1032_s10  ;;  %s1200_s18 = smov %s886_s19 }
 0x170   : > { %s1201_s19 = smov %s1203_s5  ;;  %20 = sbr.rel (!%p18_p5) target bundleno = 7 (0x7), region = 85 }
 0x177   :  { %496 = vsyncpa [#allocation3], 1 }
 0x178   :  { %498 = vsyncpa [#allocation3 + $0x1], 1 }
 0x179   :  { %499 = vsyncpa [#allocation6], 1 }
 0x17a   :  { %500 = vsyncpa [#allocation4], 1 }
 0x17b   :  { %502 = vsyncpa [#allocation4 + $0x1], 1 }

</bundles_post_ra>
